<compile_context>
chip_gen: v7x
topology: tpu7x:2x2x1
jax: 0.10.0
libtpu: 0.0.40
codegen_flags: <defaults>
</compile_context>

<pallas_src>
import functools

import jax
import jax.numpy as jnp
from jax.experimental import pallas as pl
from jax.experimental.pallas import tpu as pltpu

EPS = 1e-5
EXPANSION = 4  # Bottleneck expansion


# ------------------------------- tiling utils -------------------------------

def _round_up(x, m):
    return (x + m - 1) // m * m


def _pick_tile(dim, candidates):
    for c in candidates:
        if dim % c == 0:
            return c
    return dim


def _vmem_limit(nbytes):
    # actual working set + slack; clamp to a range safe across v5e/v6e (128 MiB)
    # and v7x (64 MiB physical VMEM).
    return int(min(max(nbytes + (4 << 20), 16 << 20), 48 << 20))


def _m_tiling(m):
    """Return (mpad, tm): one tile when <=512 rows, else 512-row tiles
    (M padded up so tm never collapses below 512 on the large layers)."""
    mpad8 = _round_up(m, 8)
    if mpad8 <= 512:
        return mpad8, mpad8
    return _round_up(m, 512), 512


# ----------------------------- Pallas kernels ------------------------------

def _gemm_stats_kernel(a_ref, w_ref, o_ref, s1_ref, s2_ref):
    """bf16 (tm,Kpad) @ bf16 (Kpad,cout_pad) with fp32 MXU accumulation.

    Full-K, full-cout weight panel resident in VMEM -> a single dot per M-tile.
    Emits the bf16 conv tile plus fp32 per-channel column sum / sum-of-squares
    (exact cross-M-tile BatchNorm statistics computed from the fp32 result).
    """
    acc = jnp.dot(a_ref[...], w_ref[...], preferred_element_type=jnp.float32)
    o_ref[...] = acc.astype(o_ref.dtype)
    s1_ref[...] = jnp.sum(acc, axis=0, keepdims=True)[None]
    s2_ref[...] = jnp.sum(acc * acc, axis=0, keepdims=True)[None]


def _bn_act_kernel(x_ref, sc_ref, sh_ref, o_ref, *, relu):
    # y = conv * scale + shift  [+ ReLU]   (fp32 math, bf16 in/out)
    y = x_ref[...].astype(jnp.float32) * sc_ref[...] + sh_ref[...]
    if relu:
        y = jnp.maximum(y, 0.0)
    o_ref[...] = y.astype(o_ref.dtype)


def _bn_act_res_kernel(x_ref, sc_ref, sh_ref, r_ref, o_ref, *, relu):
    # BN affine -> + residual -> (optional) ReLU (Bottleneck tail uses relu=True).
    y = (x_ref[...].astype(jnp.float32) * sc_ref[...] + sh_ref[...]
         + r_ref[...].astype(jnp.float32))
    if relu:
        y = jnp.maximum(y, 0.0)
    o_ref[...] = y.astype(o_ref.dtype)


def _maxpool_kernel(x_ref, o_ref):
    # x: (9, tm, C) with the tap axis LEADING -> 8 pure-VPU elementwise maxima.
    o_ref[...] = jnp.max(x_ref[...], axis=0)


def _avgpool_kernel(x_ref, o_ref, *, inv_hw):
    # x: (N, HW, tc) bf16 -> fp32 mean over spatial positions.
    o_ref[...] = jnp.sum(x_ref[...].astype(jnp.float32), axis=1) * inv_hw


def _fc_kernel(x_ref, w_ref, b_ref, o_ref):
    o_ref[...] = (
        jnp.dot(x_ref[...], w_ref[...], preferred_element_type=jnp.float32)
        + b_ref[...]
    )


# ------------------------------ glue helpers -------------------------------

def _im2col(x, kh, kw, stride, pad, pad_value=0.0):
    """x: (N,H,W,C) NHWC -> patches (N,Ho,Wo,KH*KW,C)."""
    n, h, w, c = x.shape
    xp = jnp.pad(
        x, ((0, 0), (pad, pad), (pad, pad), (0, 0)), constant_values=pad_value
    )
    ho = (h + 2 * pad - kh) // stride + 1
    wo = (w + 2 * pad - kw) // stride + 1
    cols = []
    for i in range(kh):
        for j in range(kw):
            cols.append(
                xp[:, i: i + (ho - 1) * stride + 1: stride,
                      j: j + (wo - 1) * stride + 1: stride, :]
            )
    patches = jnp.stack(cols, axis=3)  # (N, Ho, Wo, KH*KW, C)
    return patches, ho, wo


def conv_bn(x, w_oihw, gamma, beta, *, stride, pad, relu, residual=None):
    """Conv2d(bias=False) + BatchNorm2d(train) [+ residual] [+ ReLU] -> bf16."""
    n, _, _, cin = x.shape
    cout, cin_w, kh, kw = w_oihw.shape
    assert cin_w == cin

    # --- im2col in bf16 (MXU inputs); 1x1 convs are a pure (strided) reshape.
    xb = x.astype(jnp.bfloat16)
    if kh == 1 and kw == 1 and pad == 0:
        xs = xb[:, ::stride, ::stride, :]
        ho, wo = xs.shape[1], xs.shape[2]
        a = xs.reshape(n * ho * wo, cin)
    else:
        patches, ho, wo = _im2col(xb, kh, kw, stride, pad, pad_value=0.0)
        a = patches.reshape(n * ho * wo, kh * kw * cin)

    m = n * ho * wo
    k = kh * kw * cin
    kpad = _round_up(k, 128)            # zero-padded K columns: exact
    cpad = _round_up(cout, 128)         # lane-dense stores (no masked vst)
    mpad, tm = _m_tiling(m)
    ni = mpad // tm

    wmat = (jnp.transpose(w_oihw, (2, 3, 1, 0))
            .reshape(k, cout).astype(jnp.bfloat16))
    if mpad != m or kpad != k:
        a = jnp.pad(a, ((0, mpad - m), (0, kpad - k)))     # zero rows/cols
    if kpad != k or cpad != cout:
        wmat = jnp.pad(wmat, ((0, kpad - k), (0, cpad - cout)))

    # --- GEMM + per-tile BN partial stats, full-K / full-cout resident W panel.
    gemm_bytes = (2 * tm * kpad * 2 + 2 * kpad * cpad * 2 + 2 * tm * cpad * 2)
    conv_out, ps1, ps2 = pl.pallas_call(
        _gemm_stats_kernel,
        out_shape=(jax.ShapeDtypeStruct((mpad, cpad), jnp.bfloat16),
                   jax.ShapeDtypeStruct((ni, 1, cpad), jnp.float32),
                   jax.ShapeDtypeStruct((ni, 1, cpad), jnp.float32)),
        grid=(ni,),
        in_specs=[
            pl.BlockSpec((tm, kpad), lambda i: (i, 0)),
            pl.BlockSpec((kpad, cpad), lambda i: (0, 0)),   # resident W panel
        ],
        out_specs=(
            pl.BlockSpec((tm, cpad), lambda i: (i, 0)),
            pl.BlockSpec((1, 1, cpad), lambda i: (i, 0, 0)),
            pl.BlockSpec((1, 1, cpad), lambda i: (i, 0, 0)),
        ),
        compiler_params=pltpu.CompilerParams(
            dimension_semantics=("parallel",),
            vmem_limit_bytes=_vmem_limit(gemm_bytes)),
    )(a, wmat)

    # --- exact batch statistics (cross-M-tile reduction; O(ni*cout) glue).
    s1 = jnp.sum(ps1, axis=(0, 1))
    s2 = jnp.sum(ps2, axis=(0, 1))
    mean = s1 / m                                       # true (unpadded) M
    var = jnp.maximum(s2 / m - mean * mean, 0.0)        # biased var (train mode)
    g = gamma.astype(jnp.float32)
    bta = beta.astype(jnp.float32)
    if cpad != cout:
        g = jnp.pad(g, (0, cpad - cout))                # padded channels stay 0
        bta = jnp.pad(bta, (0, cpad - cout))
    rstd = jax.lax.rsqrt(var + EPS)
    scale2 = (g * rstd).reshape(1, cpad)
    shift2 = (bta - mean * g * rstd).reshape(1, cpad)

    # --- fused scale/shift (+ residual) (+ ReLU) epilogue, bf16 in/out.
    in_specs = [
        pl.BlockSpec((tm, cpad), lambda i: (i, 0)),
        pl.BlockSpec((1, cpad), lambda i: (0, 0)),
        pl.BlockSpec((1, cpad), lambda i: (0, 0)),
    ]
    args = [conv_out, scale2, shift2]
    if residual is not None:
        r = residual.astype(jnp.bfloat16).reshape(m, cout)
        if mpad != m or cpad != cout:
            r = jnp.pad(r, ((0, mpad - m), (0, cpad - cout)))
        in_specs.append(pl.BlockSpec((tm, cpad), lambda i: (i, 0)))
        args.append(r)
        kernel = functools.partial(_bn_act_res_kernel, relu=relu)
    else:
        kernel = functools.partial(_bn_act_kernel, relu=relu)

    epi_bytes = 2 * (len(args) + 1) * tm * cpad * 2
    out = pl.pallas_call(
        kernel,
        out_shape=jax.ShapeDtypeStruct((mpad, cpad), jnp.bfloat16),
        grid=(ni,),
        in_specs=in_specs,
        out_specs=pl.BlockSpec((tm, cpad), lambda i: (i, 0)),
        compiler_params=pltpu.CompilerParams(
            dimension_semantics=("parallel",),
            vmem_limit_bytes=_vmem_limit(epi_bytes)),
    )(*args)
    if mpad != m or cpad != cout:
        out = out[:m, :cout]
    return out.reshape(n, ho, wo, cout)


def maxpool_3x3_s2(x):
    n, h, w, c = x.shape
    xp = jnp.pad(x, ((0, 0), (1, 1), (1, 1), (0, 0)),
                 constant_values=-jnp.inf)
    ho = (h + 2 - 3) // 2 + 1
    wo = (w + 2 - 3) // 2 + 1
    # Tap axis LEADING: (9, M, C) -> pure-VPU elementwise maxima in the kernel.
    taps = [xp[:, i: i + (ho - 1) * 2 + 1: 2, j: j + (wo - 1) * 2 + 1: 2, :]
            for i in range(3) for j in range(3)]
    m = n * ho * wo
    p = jnp.stack(taps, axis=0).reshape(9, m, c)
    mpad, tm = _m_tiling(m)
    if mpad != m:
        p = jnp.pad(p, ((0, 0), (0, mpad - m), (0, 0)))
    out = pl.pallas_call(
        _maxpool_kernel,
        out_shape=jax.ShapeDtypeStruct((mpad, c), x.dtype),
        grid=(mpad // tm,),
        in_specs=[pl.BlockSpec((9, tm, c), lambda i: (0, i, 0))],
        out_specs=pl.BlockSpec((tm, c), lambda i: (i, 0)),
        compiler_params=pltpu.CompilerParams(
            dimension_semantics=("parallel",),
            vmem_limit_bytes=_vmem_limit(2 * 10 * tm * c * 2)),
    )(p)
    if mpad != m:
        out = out[:m]
    return out.reshape(n, ho, wo, c)


def global_avgpool(x):
    n, h, w, c = x.shape
    hw = h * w
    xf = x.reshape(n, hw, c)
    tc = _pick_tile(c, (512, 256, 128))
    return pl.pallas_call(
        functools.partial(_avgpool_kernel, inv_hw=1.0 / hw),
        out_shape=jax.ShapeDtypeStruct((n, c), jnp.float32),
        grid=(c // tc,),
        in_specs=[pl.BlockSpec((n, hw, tc), lambda j: (0, 0, j))],
        out_specs=pl.BlockSpec((n, tc), lambda j: (0, j)),
        compiler_params=pltpu.CompilerParams(
            dimension_semantics=("parallel",)),
    )(xf)


def linear(x, w, b):
    """PyTorch Linear: x @ w.T + b, with w: (out, in)."""
    n, cin = x.shape
    cout = w.shape[0]
    return pl.pallas_call(
        _fc_kernel,
        out_shape=jax.ShapeDtypeStruct((n, cout), jnp.float32),
        compiler_params=pltpu.CompilerParams(
            vmem_limit_bytes=_vmem_limit(4 * (n * cin + cin * cout
                                              + cout + n * cout))),
    )(x, jnp.transpose(w), b.reshape(1, -1))


# ------------------------------ parameters ---------------------------------

def _conv_w(key, cout, cin, kh, kw):
    fan_in = cin * kh * kw
    return (jax.random.normal(key, (cout, cin, kh, kw), jnp.float32)
            * (2.0 / fan_in) ** 0.5)


def _bn_params(key, c):
    k1, k2 = jax.random.split(key)
    gamma = 1.0 + 0.1 * jax.random.normal(k1, (c,), jnp.float32)
    beta = 0.1 * jax.random.normal(k2, (c,), jnp.float32)
    return gamma, beta


def init_params(key, layers, num_classes):
    keys = iter(jax.random.split(key, 128))
    nk = lambda: next(keys)
    params = {
        "conv": _conv_w(nk(), 64, 3, 7, 7),
        "bn": _bn_params(nk(), 64),
    }
    in_ch = 64
    all_layers = []
    for out_ch, nblocks, stride in zip((64, 128, 256, 512), layers, (1, 2, 2, 2)):
        layer_blocks = []
        for bi in range(nblocks):
            s = stride if bi == 0 else 1
            blk = {
                "stride": s,
                "conv1": _conv_w(nk(), out_ch, in_ch, 1, 1),
                "bn1": _bn_params(nk(), out_ch),
                "conv2": _conv_w(nk(), out_ch, out_ch, 3, 3),
                "bn2": _bn_params(nk(), out_ch),
                "conv3": _conv_w(nk(), out_ch * EXPANSION, out_ch, 1, 1),
                "bn3": _bn_params(nk(), out_ch * EXPANSION),
            }
            if s != 1 or in_ch != out_ch * EXPANSION:
                blk["ds_conv"] = _conv_w(nk(), out_ch * EXPANSION, in_ch, 1, 1)
                blk["ds_bn"] = _bn_params(nk(), out_ch * EXPANSION)
            layer_blocks.append(blk)
            in_ch = out_ch * EXPANSION
        all_layers.append(layer_blocks)
    params["layers"] = all_layers
    params["fc_w"] = 0.01 * jax.random.normal(
        nk(), (num_classes, 512 * EXPANSION), jnp.float32)
    params["fc_b"] = 0.01 * jax.random.normal(nk(), (num_classes,), jnp.float32)
    return params


# ------------------------------ forward pass --------------------------------

def bottleneck_forward(x, blk):
    identity = x
    out = conv_bn(x, blk["conv1"], *blk["bn1"], stride=1, pad=0, relu=True)
    out = conv_bn(out, blk["conv2"], *blk["bn2"],
                  stride=blk["stride"], pad=1, relu=True)
    if "ds_conv" in blk:
        identity = conv_bn(x, blk["ds_conv"], *blk["ds_bn"],
                           stride=blk["stride"], pad=0, relu=False)
    # ReLU is applied AFTER the residual add (torchvision Bottleneck tail).
    out = conv_bn(out, blk["conv3"], *blk["bn3"],
                  stride=1, pad=0, relu=True, residual=identity)
    return out


def resnet_forward(params, x_nchw):
    x = jnp.transpose(x_nchw, (0, 2, 3, 1))  # NCHW -> NHWC
    out = conv_bn(x, params["conv"], *params["bn"], stride=2, pad=3, relu=True)
    out = maxpool_3x3_s2(out)
    for layer in params["layers"]:
        for blk in layer:
            out = bottleneck_forward(out, blk)
    pooled = global_avgpool(out)          # AdaptiveAvgPool2d((1,1)) + flatten
    return linear(pooled, params["fc_w"], params["fc_b"])


if __name__ == "__main__":
    key = jax.random.PRNGKey(0)
    kp, kx = jax.random.split(key)
    # Small config: one Bottleneck per stage, 10 classes, 2x3x32x32 input.
    params = init_params(kp, layers=(1, 1, 1, 1), num_classes=10)
    x = jax.random.normal(kx, (2, 3, 32, 32), jnp.float32)
    logits = resnet_forward(params, x)
    jax.block_until_ready(logits)
    assert logits.shape == (2, 10) and logits.dtype == jnp.float32
    print("KERNEL_OK")
</pallas_src>

<mosaic_0001>
module attributes {stable_mosaic.version = 11 : i64} {
  func.func @_gemm_stats_kernel(%arg0: i32, %arg1: memref<512x256xbf16, #tpu.memory_space<vmem>>, %arg2: memref<256x128xbf16, #tpu.memory_space<vmem>>, %arg3: memref<512x128xbf16, #tpu.memory_space<vmem>>, %arg4: memref<1x1x128xf32, #tpu.memory_space<vmem>>, %arg5: memref<1x1x128xf32, #tpu.memory_space<vmem>>) attributes {dimension_semantics = [#tpu.dimension_semantics<parallel>], iteration_bounds = array<i64: 1>, scalar_prefetch = 0 : i64, scratch_operands = 0 : i64, tpu.core_type = #tpu.core_type<tc>, window_params = [{transform_indices = @transform_0, window_bounds = array<i64: 512, 256>}, {pipeline_mode = #tpu.pipeline_mode<synchronous>, transform_indices = @transform_1, window_bounds = array<i64: 256, 128>}, {transform_indices = @transform_2, window_bounds = array<i64: 512, 128>}, {transform_indices = @transform_3, window_bounds = array<i64: 1, 1, 128>}, {transform_indices = @transform_4, window_bounds = array<i64: 1, 1, 128>}]} {
    %c0 = arith.constant 0 : index
    %c0_0 = arith.constant 0 : index
    %0 = vector.load %arg1[%c0, %c0_0] : memref<512x256xbf16, #tpu.memory_space<vmem>>, vector<512x256xbf16>
    %c0_1 = arith.constant 0 : index
    %c0_2 = arith.constant 0 : index
    %1 = vector.load %arg2[%c0_1, %c0_2] : memref<256x128xbf16, #tpu.memory_space<vmem>>, vector<256x128xbf16>
    %cst = arith.constant dense<0.000000e+00> : vector<512x128xf32>
    %2 = tpu.matmul %0, %1, %cst {dimension_numbers = #tpu.dot_dimension_numbers<[1], [0], [0], [1], [0, 0, 1, 1], [], []>} : vector<512x256xbf16>, vector<256x128xbf16>, vector<512x128xf32> -> vector<512x128xf32>
    %3 = arith.truncf %2 : vector<512x128xf32> to vector<512x128xbf16>
    %c0_3 = arith.constant 0 : index
    %c0_4 = arith.constant 0 : index
    %4 = vector.load %arg3[%c0_3, %c0_4] : memref<512x128xbf16, #tpu.memory_space<vmem>>, vector<512x128xbf16>
    tpu.vector_store %arg3[%c0_3, %c0_4], %3 {strides = array<i32>} : memref<512x128xbf16, #tpu.memory_space<vmem>>, vector<512x128xbf16>,
    %cst_5 = arith.constant dense<0.000000e+00> : vector<128xf32>
    %5 = vector.multi_reduction <add>, %2, %cst_5 [0] : vector<512x128xf32> to vector<128xf32>
    %6 = vector.shape_cast %5 : vector<128xf32> to vector<1x128xf32>
    %7 = vector.shape_cast %6 : vector<1x128xf32> to vector<1x1x128xf32>
    %c0_6 = arith.constant 0 : index
    %c0_7 = arith.constant 0 : index
    %c0_8 = arith.constant 0 : index
    %8 = vector.load %arg4[%c0_6, %c0_7, %c0_8] : memref<1x1x128xf32, #tpu.memory_space<vmem>>, vector<1x1x128xf32>
    tpu.vector_store %arg4[%c0_6, %c0_7, %c0_8], %7 {strides = array<i32>} : memref<1x1x128xf32, #tpu.memory_space<vmem>>, vector<1x1x128xf32>,
    %9 = arith.mulf %2, %2 : vector<512x128xf32>
    %cst_9 = arith.constant dense<0.000000e+00> : vector<128xf32>
    %10 = vector.multi_reduction <add>, %9, %cst_9 [0] : vector<512x128xf32> to vector<128xf32>
    %11 = vector.shape_cast %10 : vector<128xf32> to vector<1x128xf32>
    %12 = vector.shape_cast %11 : vector<1x128xf32> to vector<1x1x128xf32>
    %c0_10 = arith.constant 0 : index
    %c0_11 = arith.constant 0 : index
    %c0_12 = arith.constant 0 : index
    %13 = vector.load %arg5[%c0_10, %c0_11, %c0_12] : memref<1x1x128xf32, #tpu.memory_space<vmem>>, vector<1x1x128xf32>
    tpu.vector_store %arg5[%c0_10, %c0_11, %c0_12], %12 {strides = array<i32>} : memref<1x1x128xf32, #tpu.memory_space<vmem>>, vector<1x1x128xf32>,
    return
  }
  func.func @transform_0(%arg0: i32) -> (i32, i32) {
    %c0_i32 = arith.constant 0 : i32
    %c0_i32_0 = arith.constant 0 : i32
    return %arg0, %c0_i32 : i32, i32
  }
  func.func @transform_1(%arg0: i32) -> (i32, i32) {
    %c0_i32 = arith.constant 0 : i32
    %c0_i32_0 = arith.constant 0 : i32
    %c0_i32_1 = arith.constant 0 : i32
    return %c0_i32, %c0_i32_0 : i32, i32
  }
  func.func @transform_2(%arg0: i32) -> (i32, i32) {
    %c0_i32 = arith.constant 0 : i32
    %c0_i32_0 = arith.constant 0 : i32
    return %arg0, %c0_i32 : i32, i32
  }
  func.func @transform_3(%arg0: i32) -> (i32, i32, i32) {
    %c0_i32 = arith.constant 0 : i32
    %c0_i32_0 = arith.constant 0 : i32
    %c0_i32_1 = arith.constant 0 : i32
    return %arg0, %c0_i32, %c0_i32_0 : i32, i32, i32
  }
  func.func @transform_4(%arg0: i32) -> (i32, i32, i32) {
    %c0_i32 = arith.constant 0 : i32
    %c0_i32_0 = arith.constant 0 : i32
    %c0_i32_1 = arith.constant 0 : i32
    return %arg0, %c0_i32, %c0_i32_0 : i32, i32, i32
  }
}

</mosaic_0001>

<bundles_post_ra>
// kernel: tpu_custom_call.1
= control target key start
LH: loop header
LB: loop body
LE: loop exit
PB: predicated region body
PF: predicated region fallthrough
CT: control target
= control target key end

     0   :  { %10 = vsyncpa [#allocation3], 0  ;;  %s2419_s0 = inlined_call_operand.hbm [shape: bf16[512,256], index: 0, kind: input, shape index: {}]   ;;  %s2420_s1 = inlined_call_operand.hbm [shape: bf16[256,128], index: 1, kind: input, shape index: {}]   ;;  %s2421_s2 = inlined_call_operand.hbm [shape: bf16[512,128], index: 2, kind: output, shape index: {0}]   ;;  %s2422_s3 = inlined_call_operand.hbm [shape: f32[1,1,128], index: 3, kind: output, shape index: {1}]   ;;  %s2423_s4 = inlined_call_operand.hbm [shape: f32[1,1,128], index: 4, kind: output, shape index: {2}]  }
   0x1   :  { %11 = vsyncpa [#allocation6], 0 }
   0x2   :  { %12 = vsyncpa [#allocation4], 0 }
   0x3   :  { %13 = vsyncpa [#allocation9], 0  ;;  %s2086_s15 = smov [#allocation2]   ;;  %s1968_s19 = scalar_lea.hbm %s2419_s0, 8192 }
   0x4   :  { %s19_s16 = sshll.u32 %s2086_s15, 4  ;;  %p1969_p0 = scmp.ne.s32.totalorder %s2419_s0, %s1968_s19  ;;  %s20_s16 = int_to_ptr.vmem [resolvable:$true] %s19_s16 }
   0x5   :  { %p1972_p1 = scmp.lt.u32.totalorder %s1968_s19, %s2419_s0 }
   0x7   :  { %p1974_p2 = pnand %p1972_p1, %p1969_p0 }
   0x9   :  { %1977 = shalt.err (!%p1974_p2)
}
   0xa   :  { %s1978_s24 = scalar_lea.vmem %s20_s16, 8192  ;;  %p1983_p4 = scmp.lt.s32.totalorder %s20_s16, %s20_s16 }
   0xb   :  { %p1979_p3 = scmp.ne.s32.totalorder %s20_s16, %s1978_s24  ;;  %p1984_p5 = scmp.lt.s32.totalorder %s1978_s24, %s1978_s24 }
   0xd   :  { %p1985_p6 = por %p1984_p5, %p1983_p4 }
   0xf   :  { %p1986_p7 = pnand %p1985_p6, %p1979_p3 }
  0x11   :  { %1989 = shalt.err (!%p1986_p7)
}
  0x12   :  { %s2087_s25 = smov 128   ;;  %s2088_s26 = smov 8  }
  0x13   :  { %25 = dma.hbm_to_vmem [thread:$0]  %s2419_s0, 8192, %s20_s16, [#allocation3], %s2087_s25, %s2087_s25, %s2088_s26  }
  0x14   :  { %s2089_s29 = smov [#allocation5]   ;;  %s1990_s7 = scalar_lea.hbm %s2420_s1, 2048 }
  0x15   :  { %s31_s30 = sshll.u32 %s2089_s29, 4  ;;  %p1991_p8 = scmp.ne.s32.totalorder %s2420_s1, %s1990_s7  ;;  %s32_s30 = int_to_ptr.vmem [resolvable:$true] %s31_s30 }
  0x16   :  { %p1994_p9 = scmp.lt.u32.totalorder %s1990_s7, %s2420_s1 }
  0x18   :  { %p1996_p10 = pnand %p1994_p9, %p1991_p8 }
  0x1a   :  { %1999 = shalt.err (!%p1996_p10)
}
  0x1b   :  { %s2000_s12 = scalar_lea.vmem %s32_s30, 2048  ;;  %p2005_p12 = scmp.lt.s32.totalorder %s32_s30, %s32_s30 }
  0x1c   :  { %p2001_p11 = scmp.ne.s32.totalorder %s32_s30, %s2000_s12  ;;  %p2006_p13 = scmp.lt.s32.totalorder %s2000_s12, %s2000_s12 }
  0x1e   :  { %p2007_p0 = por %p2006_p13, %p2005_p12 }
  0x20   :  { %p2008_p1 = pnand %p2007_p0, %p2001_p11 }
  0x22   :  { %2011 = shalt.err (!%p2008_p1)
}
  0x23   :  { %s2090_s0 = smov 64   ;;  %s2091_s13 = smov 4  }
  0x24   :  { %37 = dma.hbm_to_vmem [thread:$0]  %s2420_s1, 2048, %s32_s30, [#allocation6], %s2090_s0, %s2090_s0, %s2091_s13  }
  0x25   :  { %2078 = dma.done.wait [#allocation3], 8192  }
  0x26   :  { %2079 = vsyncadd [#allocation3], 4294959104 }
  0x27   :  { %2080 = dma.done.wait [#allocation6], 2048  }
  0x28   :  { %2081 = vsyncadd [#allocation6], 4294965248  ;;  %v2092_v0 = vmov 0   ;;  %v1856_v1 = vld [vmem:[#allocation5] sm:$0xff]   ;;  %v1857_v2 = vld [vmem:[#allocation5 + $0x8] sm:$0xff]   ;;  %s2093_s1 = smov [#allocation7]  }
  0x29   :  { %557 = vmatprep.subr.bf16.mxu0 %v2092_v0  ;;  %1814 = vmatprep.subr.bf16.mxu1 %v2092_v0  ;;  %v1858_v3 = vld [vmem:[#allocation5 + $0x10] sm:$0xff]   ;;  %v1859_v4 = vld [vmem:[#allocation5 + $0x18] sm:$0xff]   ;;  %v1860_v5 = vld [vmem:[#allocation5 + $0x20] sm:$0xff]   ;;  %s1375_s16 = sshll.u32 %s2093_s1, 4  ;;  %s1376_s16 = int_to_ptr.vmem [resolvable:$true] %s1375_s16 }
  0x2a   :  { %558 = vmatpush1.bf16.msra.mxu0 %v1856_v1  ;;  %1830 = vmatpush1.bf16.msra.mxu1 %v1856_v1  ;;  %v1874_v6 = vld [vmem:[#allocation2 + $0x4] ss:$8 sps:$4 sm:$0xff]   ;;  %v1862_v8 = vld [vmem:[#allocation5 + $0x30] sm:$0xff]   ;;  %v1863_v9 = vld [vmem:[#allocation5 + $0x38] sm:$0xff]   ;;  %s2012_s17 = scalar_lea.vmem %s1376_s16, 4096  ;;  %p2017_p3 = scmp.lt.s32.totalorder %s1376_s16, %s1376_s16 }
  0x2b   :  { %559 = vmatprep.subr.bf16.mxu0 %v2092_v0  ;;  %1815 = vmatprep.subr.bf16.mxu1 %v2092_v0  ;;  %v1861_v7 = vld [vmem:[#allocation5 + $0x28] sm:$0xff]   ;;  %v1864_v11 = vld [vmem:[#allocation5 + $0x40] sm:$0xff]   ;;  %v1866_v13 = vld [vmem:[#allocation5 + $0x50] sm:$0xff]   ;;  %p2013_p2 = scmp.ne.s32.totalorder %s1376_s16, %s2012_s17  ;;  %p2018_p4 = scmp.lt.s32.totalorder %s2012_s17, %s2012_s17 }
  0x2c   :  { %589 = vmatprep.mubr.bf16.mxu0 %v1874_v6  ;;  %v1898_v10 = vld [vmem:[#allocation2 + $0x104] ss:$8 sps:$4 sm:$0xff]   ;;  %v1867_v14 = vld [vmem:[#allocation5 + $0x58] sm:$0xff]   ;;  %v1870_v17 = vld [vmem:[#allocation5 + $0x70] sm:$0xff]  }
  0x2d   :  { %717 = vmatprep.mubr.bf16.mxu1 %v1898_v10  ;;  %v1865_v12 = vld [vmem:[#allocation5 + $0x48] sm:$0xff]   ;;  %v1868_v15 = vld [vmem:[#allocation5 + $0x60] sm:$0xff]   ;;  %v1871_v18 = vld [vmem:[#allocation5 + $0x78] sm:$0xff]   ;;  %p2019_p5 = por %p2018_p4, %p2017_p3 }
  0x2e   :  { %560 = vmatpush1.bf16.msra.mxu0 %v1857_v2  ;;  %1831 = vmatpush1.bf16.msra.mxu1 %v1857_v2  ;;  %v1869_v16 = vld [vmem:[#allocation5 + $0x68] sm:$0xff]   ;;  %v1875_v21 = vld [vmem:[#allocation2 + $0x14] ss:$8 sps:$4 sm:$0xff]   ;;  %v1877_v23 = vld [vmem:[#allocation2 + $0x10] ss:$8 sps:$4 sm:$0xff]  }
  0x2f   :  { %561 = vmatprep.subr.bf16.mxu0 %v2092_v0  ;;  %1816 = vmatprep.subr.bf16.mxu1 %v2092_v0  ;;  %v1872_v19 = vld [vmem:[#allocation2] ss:$8 sps:$4 sm:$0xff]   ;;  %v1902_v22 = vld [vmem:[#allocation2 + $0x114] ss:$8 sps:$4 sm:$0xff]   ;;  %v1904_v24 = vld [vmem:[#allocation2 + $0x110] ss:$8 sps:$4 sm:$0xff]   ;;  %p2020_p6 = pnand %p2019_p5, %p2013_p2 }
  0x30   :  { %v1896_v20 = vld [vmem:[#allocation2 + $0x100] ss:$8 sps:$4 sm:$0xff]   ;;  %v1878_v25 = vld [vmem:[#allocation2 + $0x24] ss:$8 sps:$4 sm:$0xff]   ;;  %v1881_v29 = vld [vmem:[#allocation2 + $0x34] ss:$8 sps:$4 sm:$0xff]  }
  0x31   :  { %v1908_v26 = vld [vmem:[#allocation2 + $0x124] ss:$8 sps:$4 sm:$0xff]   ;;  %v1880_v27 = vld [vmem:[#allocation2 + $0x20] ss:$8 sps:$4 sm:$0xff]   ;;  %v1914_v30 = vld [vmem:[#allocation2 + $0x134] ss:$8 sps:$4 sm:$0xff]  }
  0x32   :  { %562 = vmatpush1.bf16.msra.mxu0 %v1858_v3  ;;  %1832 = vmatpush1.bf16.msra.mxu1 %v1858_v3  ;;  %v1910_v28 = vld [vmem:[#allocation2 + $0x120] ss:$8 sps:$4 sm:$0xff]   ;;  %v1883_v31 = vld [vmem:[#allocation2 + $0x30] ss:$8 sps:$4 sm:$0xff]   ;;  %v1884_v33 = vld [vmem:[#allocation2 + $0x44] ss:$8 sps:$4 sm:$0xff]  }
  0x33   :  { %563 = vmatprep.subr.bf16.mxu0 %v2092_v0  ;;  %1817 = vmatprep.subr.bf16.mxu1 %v2092_v0  ;;  %v1916_v32 = vld [vmem:[#allocation2 + $0x130] ss:$8 sps:$4 sm:$0xff]   ;;  %v1920_v34 = vld [vmem:[#allocation2 + $0x144] ss:$8 sps:$4 sm:$0xff]   ;;  %v1886_v35 = vld [vmem:[#allocation2 + $0x40] ss:$8 sps:$4 sm:$0xff]  }
  0x34   :  { %v1922_v36 = vld [vmem:[#allocation2 + $0x140] ss:$8 sps:$4 sm:$0xff]   ;;  %v1887_v37 = vld [vmem:[#allocation2 + $0x54] ss:$8 sps:$4 sm:$0xff]   ;;  %v1889_v39 = vld [vmem:[#allocation2 + $0x50] ss:$8 sps:$4 sm:$0xff]  }
  0x35   :  { %v1926_v38 = vld [vmem:[#allocation2 + $0x154] ss:$8 sps:$4 sm:$0xff]   ;;  %v1928_v40 = vld [vmem:[#allocation2 + $0x150] ss:$8 sps:$4 sm:$0xff]   ;;  %v1890_v41 = vld [vmem:[#allocation2 + $0x64] ss:$8 sps:$4 sm:$0xff]  }
  0x36   :  { %564 = vmatpush1.bf16.msra.mxu0 %v1859_v4  ;;  %1833 = vmatpush1.bf16.msra.mxu1 %v1859_v4  ;;  %v1932_v42 = vld [vmem:[#allocation2 + $0x164] ss:$8 sps:$4 sm:$0xff]   ;;  %v1892_v43 = vld [vmem:[#allocation2 + $0x60] ss:$8 sps:$4 sm:$0xff]   ;;  %v1893_v45 = vld [vmem:[#allocation2 + $0x74] ss:$8 sps:$4 sm:$0xff]  }
  0x37   :  { %565 = vmatprep.subr.bf16.mxu0 %v2092_v0  ;;  %1818 = vmatprep.subr.bf16.mxu1 %v2092_v0  ;;  %v1934_v44 = vld [vmem:[#allocation2 + $0x160] ss:$8 sps:$4 sm:$0xff]   ;;  %v1938_v46 = vld [vmem:[#allocation2 + $0x174] ss:$8 sps:$4 sm:$0xff]   ;;  %v1895_v47 = vld [vmem:[#allocation2 + $0x70] ss:$8 sps:$4 sm:$0xff]  }
  0x38   :  { %v1940_v48 = vld [vmem:[#allocation2 + $0x170] ss:$8 sps:$4 sm:$0xff]   ;;  %v1899_v49 = vld [vmem:[#allocation2 + $0x84] ss:$8 sps:$4 sm:$0xff]   ;;  %v1901_v51 = vld [vmem:[#allocation2 + $0x80] ss:$8 sps:$4 sm:$0xff]  }
  0x39   :  { %v1944_v50 = vld [vmem:[#allocation2 + $0x184] ss:$8 sps:$4 sm:$0xff]   ;;  %v1946_v52 = vld [vmem:[#allocation2 + $0x180] ss:$8 sps:$4 sm:$0xff]   ;;  %v1905_v53 = vld [vmem:[#allocation2 + $0x94] ss:$8 sps:$4 sm:$0xff]  }
  0x3a   :  { %566 = vmatpush1.bf16.msra.mxu0 %v1860_v5  ;;  %1834 = vmatpush1.bf16.msra.mxu1 %v1860_v5  ;;  %v1947_v54 = vld [vmem:[#allocation2 + $0x194] ss:$8 sps:$4 sm:$0xff]   ;;  %v1907_v55 = vld [vmem:[#allocation2 + $0x90] ss:$8 sps:$4 sm:$0xff]   ;;  %v1911_v57 = vld [vmem:[#allocation2 + $0xa4] ss:$8 sps:$4 sm:$0xff]  }
  0x3b   :  { %567 = vmatprep.subr.bf16.mxu0 %v2092_v0  ;;  %1819 = vmatprep.subr.bf16.mxu1 %v2092_v0  ;;  %v1949_v56 = vld [vmem:[#allocation2 + $0x190] ss:$8 sps:$4 sm:$0xff]   ;;  %v1950_v58 = vld [vmem:[#allocation2 + $0x1a4] ss:$8 sps:$4 sm:$0xff]   ;;  %v1913_v59 = vld [vmem:[#allocation2 + $0xa0] ss:$8 sps:$4 sm:$0xff]  }
  0x3c   :  { %v1952_v60 = vld [vmem:[#allocation2 + $0x1a0] ss:$8 sps:$4 sm:$0xff]   ;;  %v1917_v61 = vld [vmem:[#allocation2 + $0xb4] ss:$8 sps:$4 sm:$0xff]   ;;  %v1919_v63 = vld [vmem:[#allocation2 + $0xb0] ss:$8 sps:$4 sm:$0xff]  }
  0x3d   :  { %v1953_v62 = vld [vmem:[#allocation2 + $0x1b4] ss:$8 sps:$4 sm:$0xff]   ;;  %v1923_v1 = vld [vmem:[#allocation2 + $0xc4] ss:$8 sps:$4 sm:$0xff]   ;;  %v1925_v3 = vld [vmem:[#allocation2 + $0xc0] ss:$8 sps:$4 sm:$0xff]  }
  0x3e   :  { %568 = vmatpush1.bf16.msra.mxu0 %v1861_v7  ;;  %1835 = vmatpush1.bf16.msra.mxu1 %v1861_v7  ;;  %v1956_v2 = vld [vmem:[#allocation2 + $0x1c4] ss:$8 sps:$4 sm:$0xff]   ;;  %v1958_v4 = vld [vmem:[#allocation2 + $0x1c0] ss:$8 sps:$4 sm:$0xff]   ;;  %v1929_v5 = vld [vmem:[#allocation2 + $0xd4] ss:$8 sps:$4 sm:$0xff]  }
  0x3f   :  { %569 = vmatprep.subr.bf16.mxu0 %v2092_v0  ;;  %1820 = vmatprep.subr.bf16.mxu1 %v2092_v0  ;;  %v1959_v6 = vld [vmem:[#allocation2 + $0x1d4] ss:$8 sps:$4 sm:$0xff]   ;;  %v1931_v7 = vld [vmem:[#allocation2 + $0xd0] ss:$8 sps:$4 sm:$0xff]   ;;  %v1962_v10 = vld [vmem:[#allocation2 + $0x1e4] ss:$8 sps:$4 sm:$0xff]  }
  0x42   :  { %570 = vmatpush1.bf16.msra.mxu0 %v1862_v8  ;;  %1836 = vmatpush1.bf16.msra.mxu1 %v1862_v8  ;;  %v1961_v8 = vld [vmem:[#allocation2 + $0x1d0] ss:$8 sps:$4 sm:$0xff]  }
  0x43   :  { %571 = vmatprep.subr.bf16.mxu0 %v2092_v0  ;;  %1821 = vmatprep.subr.bf16.mxu1 %v2092_v0 }
  0x46   :  { %572 = vmatpush1.bf16.msra.mxu0 %v1863_v9  ;;  %1837 = vmatpush1.bf16.msra.mxu1 %v1863_v9  ;;  %v1935_v9 = vld [vmem:[#allocation2 + $0xe4] ss:$8 sps:$4 sm:$0xff]  }
  0x47   :  { %573 = vmatprep.subr.bf16.mxu0 %v2092_v0  ;;  %1822 = vmatprep.subr.bf16.mxu1 %v2092_v0 }
  0x4a   :  { %574 = vmatpush1.bf16.msra.mxu0 %v1864_v11  ;;  %1838 = vmatpush1.bf16.msra.mxu1 %v1864_v11  ;;  %v1937_v11 = vld [vmem:[#allocation2 + $0xe0] ss:$8 sps:$4 sm:$0xff]  }
  0x4b   :  { %575 = vmatprep.subr.bf16.mxu0 %v2092_v0  ;;  %1823 = vmatprep.subr.bf16.mxu1 %v2092_v0 }
  0x4e   :  { %576 = vmatpush1.bf16.msra.mxu0 %v1865_v12  ;;  %1839 = vmatpush1.bf16.msra.mxu1 %v1865_v12  ;;  %v1964_v12 = vld [vmem:[#allocation2 + $0x1e0] ss:$8 sps:$4 sm:$0xff]  }
  0x4f   :  { %577 = vmatprep.subr.bf16.mxu0 %v2092_v0  ;;  %1824 = vmatprep.subr.bf16.mxu1 %v2092_v0 }
  0x52   :  { %578 = vmatpush1.bf16.msra.mxu0 %v1866_v13  ;;  %1840 = vmatpush1.bf16.msra.mxu1 %v1866_v13  ;;  %v1941_v13 = vld [vmem:[#allocation2 + $0xf4] ss:$8 sps:$4 sm:$0xff]  }
  0x53   :  { %579 = vmatprep.subr.bf16.mxu0 %v2092_v0  ;;  %1825 = vmatprep.subr.bf16.mxu1 %v2092_v0 }
  0x56   :  { %580 = vmatpush1.bf16.msra.mxu0 %v1867_v14  ;;  %1841 = vmatpush1.bf16.msra.mxu1 %v1867_v14  ;;  %v1965_v14 = vld [vmem:[#allocation2 + $0x1f4] ss:$8 sps:$4 sm:$0xff]  }
  0x57   :  { %581 = vmatprep.subr.bf16.mxu0 %v2092_v0  ;;  %1826 = vmatprep.subr.bf16.mxu1 %v2092_v0 }
  0x5a   :  { %582 = vmatpush1.bf16.msra.mxu0 %v1868_v15  ;;  %1842 = vmatpush1.bf16.msra.mxu1 %v1868_v15  ;;  %v1943_v15 = vld [vmem:[#allocation2 + $0xf0] ss:$8 sps:$4 sm:$0xff]  }
  0x5b   :  { %583 = vmatprep.subr.bf16.mxu0 %v2092_v0  ;;  %1827 = vmatprep.subr.bf16.mxu1 %v2092_v0 }
  0x5e   :  { %584 = vmatpush1.bf16.msra.mxu0 %v1869_v16  ;;  %1843 = vmatpush1.bf16.msra.mxu1 %v1869_v16  ;;  %v1967_v16 = vld [vmem:[#allocation2 + $0x1f0] ss:$8 sps:$4 sm:$0xff]  }
  0x5f   :  { %585 = vmatprep.subr.bf16.mxu0 %v2092_v0  ;;  %1828 = vmatprep.subr.bf16.mxu1 %v2092_v0 }
  0x62   :  { %586 = vmatpush1.bf16.msra.mxu0 %v1870_v17  ;;  %1844 = vmatpush1.bf16.msra.mxu1 %v1870_v17 }
  0x63   :  { %587 = vmatprep.subr.bf16.mxu0 %v2092_v0  ;;  %1829 = vmatprep.subr.bf16.mxu1 %v2092_v0  ;;  %v1955_v0 = vld [vmem:[#allocation2 + $0x1b0] ss:$8 sps:$4 sm:$0xff]  }
  0x66   :  { %588 = vmatpush1.bf16.msra.mxu0 %v1871_v18  ;;  %1845 = vmatpush1.bf16.msra.mxu1 %v1871_v18 }
  0x69   :  { %590 = vmatmul.mubr.bf16.vlgmr.msra.gmra.mrb[0].mxu0 %v1872_v19  ;;  %718 = vmatmul.mubr.bf16.vlgmr.msra.gmra.mrb[0].mxu1 %v1896_v20 }
  0x6a   :  { %597 = vmatprep.mubr.bf16.mxu0 %v1875_v21  ;;  %725 = vmatprep.mubr.bf16.mxu1 %v1902_v22 }
  0x71   :  { %598 = vmatmul.mubr.bf16.gmra.mrb[4].mxu0 %v1877_v23  ;;  %726 = vmatmul.mubr.bf16.gmra.mrb[4].mxu1 %v1904_v24 }
  0x72   :  { %605 = vmatprep.mubr.bf16.mxu0 %v1878_v25  ;;  %733 = vmatprep.mubr.bf16.mxu1 %v1908_v26 }
  0x79   :  { %606 = vmatmul.mubr.bf16.gmra.mrb[8].mxu0 %v1880_v27  ;;  %734 = vmatmul.mubr.bf16.gmra.mrb[8].mxu1 %v1910_v28 }
  0x7a   :  { %613 = vmatprep.mubr.bf16.mxu0 %v1881_v29  ;;  %741 = vmatprep.mubr.bf16.mxu1 %v1914_v30 }
  0x81   :  { %614 = vmatmul.mubr.bf16.gmra.mrb[12].mxu0 %v1883_v31  ;;  %742 = vmatmul.mubr.bf16.gmra.mrb[12].mxu1 %v1916_v32 }
  0x82   :  { %621 = vmatprep.mubr.bf16.mxu0 %v1884_v33  ;;  %749 = vmatprep.mubr.bf16.mxu1 %v1920_v34 }
  0x89   :  { %622 = vmatmul.mubr.bf16.gmra.mrb[16].mxu0 %v1886_v35  ;;  %750 = vmatmul.mubr.bf16.gmra.mrb[16].mxu1 %v1922_v36 }
  0x8a   :  { %629 = vmatprep.mubr.bf16.mxu0 %v1887_v37  ;;  %757 = vmatprep.mubr.bf16.mxu1 %v1926_v38 }
  0x91   :  { %630 = vmatmul.mubr.bf16.gmra.mrb[20].mxu0 %v1889_v39  ;;  %758 = vmatmul.mubr.bf16.gmra.mrb[20].mxu1 %v1928_v40 }
  0x92   :  { %637 = vmatprep.mubr.bf16.mxu0 %v1890_v41  ;;  %765 = vmatprep.mubr.bf16.mxu1 %v1932_v42 }
  0x99   :  { %638 = vmatmul.mubr.bf16.gmra.mrb[24].mxu0 %v1892_v43  ;;  %766 = vmatmul.mubr.bf16.gmra.mrb[24].mxu1 %v1934_v44 }
  0x9a   :  { %645 = vmatprep.mubr.bf16.mxu0 %v1893_v45  ;;  %773 = vmatprep.mubr.bf16.mxu1 %v1938_v46 }
  0xa1   :  { %646 = vmatmul.mubr.bf16.gmra.mrb[28].mxu0 %v1895_v47  ;;  %774 = vmatmul.mubr.bf16.gmra.mrb[28].mxu1 %v1940_v48 }
  0xa2   :  { %653 = vmatprep.mubr.bf16.mxu0 %v1899_v49  ;;  %781 = vmatprep.mubr.bf16.mxu1 %v1944_v50 }
  0xa9   :  { %654 = vmatmul.mubr.bf16.gmra.mrb[32].mxu0 %v1901_v51  ;;  %782 = vmatmul.mubr.bf16.gmra.mrb[32].mxu1 %v1946_v52 }
  0xaa   :  { %661 = vmatprep.mubr.bf16.mxu0 %v1905_v53  ;;  %789 = vmatprep.mubr.bf16.mxu1 %v1947_v54 }
  0xb1   :  { %662 = vmatmul.mubr.bf16.gmra.mrb[36].mxu0 %v1907_v55  ;;  %790 = vmatmul.mubr.bf16.gmra.mrb[36].mxu1 %v1949_v56 }
  0xb2   :  { %669 = vmatprep.mubr.bf16.mxu0 %v1911_v57  ;;  %797 = vmatprep.mubr.bf16.mxu1 %v1950_v58 }
  0xb9   :  { %670 = vmatmul.mubr.bf16.gmra.mrb[40].mxu0 %v1913_v59  ;;  %798 = vmatmul.mubr.bf16.gmra.mrb[40].mxu1 %v1952_v60 }
  0xba   :  { %677 = vmatprep.mubr.bf16.mxu0 %v1917_v61  ;;  %805 = vmatprep.mubr.bf16.mxu1 %v1953_v62 }
  0xc1   :  { %678 = vmatmul.mubr.bf16.gmra.mrb[44].mxu0 %v1919_v63  ;;  %806 = vmatmul.mubr.bf16.gmra.mrb[44].mxu1 %v1955_v0 }
  0xc2   :  { %685 = vmatprep.mubr.bf16.mxu0 %v1923_v1  ;;  %813 = vmatprep.mubr.bf16.mxu1 %v1956_v2 }
  0xc9   :  { %686 = vmatmul.mubr.bf16.gmra.mrb[48].mxu0 %v1925_v3  ;;  %814 = vmatmul.mubr.bf16.gmra.mrb[48].mxu1 %v1958_v4 }
  0xca   :  { %693 = vmatprep.mubr.bf16.mxu0 %v1929_v5  ;;  %821 = vmatprep.mubr.bf16.mxu1 %v1959_v6 }
  0xd1   :  { %694 = vmatmul.mubr.bf16.gmra.mrb[52].mxu0 %v1931_v7  ;;  %822 = vmatmul.mubr.bf16.gmra.mrb[52].mxu1 %v1961_v8 }
  0xd2   :  { %701 = vmatprep.mubr.bf16.mxu0 %v1935_v9  ;;  %829 = vmatprep.mubr.bf16.mxu1 %v1962_v10 }
  0xd9   :  { %702 = vmatmul.mubr.bf16.gmra.mrb[56].mxu0 %v1937_v11  ;;  %830 = vmatmul.mubr.bf16.gmra.mrb[56].mxu1 %v1964_v12 }
  0xda   :  { %709 = vmatprep.mubr.bf16.mxu0 %v1941_v13  ;;  %837 = vmatprep.mubr.bf16.mxu1 %v1965_v14 }
  0xe1   :  { %710 = vmatmul.mubr.bf16.gmra.mrb[60].mxu0 %v1943_v15  ;;  %838 = vmatmul.mubr.bf16.gmra.mrb[60].mxu1 %v1967_v16 }
 0x13c   :  { %v591_v17 = vpop.f32.mrb[0].mxu0  ;;  %v2180_v18 = vpop.f32.mrb[0].mxu1 }
 0x13d   :  { %v593_v19 = vpop.f32.mrb[1].mxu0  ;;  %v721_v20 = vpop.f32.mrb[1].mxu1  ;;  %v1236_v21 = vmul.f32 %v591_v17, %v591_v17 }
 0x13e   :  { %v594_v22 = vpop.f32.mrb[2].mxu0  ;;  %v2182_v23 = vpop.f32.mrb[2].mxu1 }
 0x13f   :  { %v1626_v24 = vpack.c.bf16 %v594_v22, %v591_v17  ;;  %v1166_v25 = vadd.f32 %v594_v22, %v591_v17  ;;  %v1237_v26 = vmul.f32 %v594_v22, %v594_v22  ;;  %v596_v27 = vpop.f32.mrb[3].mxu0  ;;  %v1706_v28 = vpack.c.bf16 %v2182_v23, %v2180_v18  ;;  %v724_v29 = vpop.f32.mrb[3].mxu1 }
 0x141   :  { %1627 = vst [vmem:[#allocation7] sm:$0xff] %v1626_v24   ;;  %v1300_v30 = vadd.f32 %v1237_v26, %v1236_v21  ;;  %1798 = vst [vmem:[#allocation7 + $0x80] sm:$0xff] %v1706_v28  }
 0x144   :  { %v599_v31 = vpop.f32.mrb[4].mxu0  ;;  %v2186_v32 = vpop.f32.mrb[4].mxu1 }
 0x145   :  { %v1167_v33 = vadd.f32 %v1166_v25, %v599_v31  ;;  %v1238_v34 = vmul.f32 %v599_v31, %v599_v31  ;;  %v601_v35 = vpop.f32.mrb[5].mxu0  ;;  %v729_v36 = vpop.f32.mrb[5].mxu1 }
 0x146   :  { %v602_v37 = vpop.f32.mrb[6].mxu0  ;;  %v2188_v38 = vpop.f32.mrb[6].mxu1 }
 0x147   :  { %v1301_v39 = vadd.f32 %v1300_v30, %v1238_v34  ;;  %v1631_v40 = vpack.c.bf16 %v602_v37, %v599_v31  ;;  %v1168_v41 = vadd.f32 %v1167_v33, %v602_v37  ;;  %v1239_v42 = vmul.f32 %v602_v37, %v602_v37  ;;  %v604_v43 = vpop.f32.mrb[7].mxu0  ;;  %v732_v44 = vpop.f32.mrb[7].mxu1 }
 0x148   :  { %v1711_v45 = vpack.c.bf16 %v2188_v38, %v2186_v32 }
 0x149   :  { %1783 = vst [vmem:[#allocation7 + $0x8] sm:$0xff] %v1631_v40   ;;  %v1302_v46 = vadd.f32 %v1301_v39, %v1239_v42 }
 0x14a   :  { %1799 = vst [vmem:[#allocation7 + $0x88] sm:$0xff] %v1711_v45  }
 0x14c   :  { %v607_v47 = vpop.f32.mrb[8].mxu0  ;;  %v2192_v48 = vpop.f32.mrb[8].mxu1 }
 0x14d   :  { %v1169_v49 = vadd.f32 %v1168_v41, %v607_v47  ;;  %v1240_v50 = vmul.f32 %v607_v47, %v607_v47  ;;  %v609_v51 = vpop.f32.mrb[9].mxu0  ;;  %v737_v52 = vpop.f32.mrb[9].mxu1 }
 0x14e   :  { %v610_v53 = vpop.f32.mrb[10].mxu0  ;;  %v2194_v54 = vpop.f32.mrb[10].mxu1 }
 0x14f   :  { %v1303_v55 = vadd.f32 %v1302_v46, %v1240_v50  ;;  %v1636_v56 = vpack.c.bf16 %v610_v53, %v607_v47  ;;  %v1170_v57 = vadd.f32 %v1169_v49, %v610_v53  ;;  %v1241_v58 = vmul.f32 %v610_v53, %v610_v53  ;;  %v612_v59 = vpop.f32.mrb[11].mxu0  ;;  %v740_v60 = vpop.f32.mrb[11].mxu1 }
 0x150   :  { %v1716_v61 = vpack.c.bf16 %v2194_v54, %v2192_v48 }
 0x151   :  { %1784 = vst [vmem:[#allocation7 + $0x10] sm:$0xff] %v1636_v56   ;;  %v1304_v62 = vadd.f32 %v1303_v55, %v1241_v58 }
 0x152   :  { %1800 = vst [vmem:[#allocation7 + $0x90] sm:$0xff] %v1716_v61  }
 0x154   :  { %v615_v63 = vpop.f32.mrb[12].mxu0  ;;  %v2198_v0 = vpop.f32.mrb[12].mxu1 }
 0x155   :  { %v1171_v1 = vadd.f32 %v1170_v57, %v615_v63  ;;  %v1242_v2 = vmul.f32 %v615_v63, %v615_v63  ;;  %v617_v3 = vpop.f32.mrb[13].mxu0  ;;  %v745_v4 = vpop.f32.mrb[13].mxu1 }
 0x156   :  { %v618_v5 = vpop.f32.mrb[14].mxu0  ;;  %v2200_v6 = vpop.f32.mrb[14].mxu1 }
 0x157   :  { %v1305_v7 = vadd.f32 %v1304_v62, %v1242_v2  ;;  %v1641_v8 = vpack.c.bf16 %v618_v5, %v615_v63  ;;  %v1172_v9 = vadd.f32 %v1171_v1, %v618_v5  ;;  %v1243_v10 = vmul.f32 %v618_v5, %v618_v5  ;;  %v620_v11 = vpop.f32.mrb[15].mxu0  ;;  %v748_v12 = vpop.f32.mrb[15].mxu1 }
 0x158   :  { %v1721_v13 = vpack.c.bf16 %v2200_v6, %v2198_v0 }
 0x159   :  { %1785 = vst [vmem:[#allocation7 + $0x18] sm:$0xff] %v1641_v8   ;;  %v1306_v14 = vadd.f32 %v1305_v7, %v1243_v10 }
 0x15a   :  { %1801 = vst [vmem:[#allocation7 + $0x98] sm:$0xff] %v1721_v13  }
 0x15c   :  { %v623_v15 = vpop.f32.mrb[16].mxu0  ;;  %v2204_v16 = vpop.f32.mrb[16].mxu1 }
 0x15d   :  { %v1173_v17 = vadd.f32 %v1172_v9, %v623_v15  ;;  %v1244_v19 = vmul.f32 %v623_v15, %v623_v15  ;;  %v625_v20 = vpop.f32.mrb[17].mxu0  ;;  %v753_v21 = vpop.f32.mrb[17].mxu1 }
 0x15e   :  { %v626_v22 = vpop.f32.mrb[18].mxu0  ;;  %v2206_v24 = vpop.f32.mrb[18].mxu1 }
 0x15f   :  { %v1307_v25 = vadd.f32 %v1306_v14, %v1244_v19  ;;  %v1646_v26 = vpack.c.bf16 %v626_v22, %v623_v15  ;;  %v1174_v27 = vadd.f32 %v1173_v17, %v626_v22  ;;  %v1245_v28 = vmul.f32 %v626_v22, %v626_v22  ;;  %v628_v29 = vpop.f32.mrb[19].mxu0  ;;  %v756_v30 = vpop.f32.mrb[19].mxu1 }
 0x160   :  { %v1726_v31 = vpack.c.bf16 %v2206_v24, %v2204_v16 }
 0x161   :  { %1786 = vst [vmem:[#allocation7 + $0x20] sm:$0xff] %v1646_v26   ;;  %v1308_v33 = vadd.f32 %v1307_v25, %v1245_v28 }
 0x162   :  { %1802 = vst [vmem:[#allocation7 + $0xa0] sm:$0xff] %v1726_v31  }
 0x164   :  { %v631_v34 = vpop.f32.mrb[20].mxu0  ;;  %v2210_v35 = vpop.f32.mrb[20].mxu1 }
 0x165   :  { %v1175_v36 = vadd.f32 %v1174_v27, %v631_v34  ;;  %v1246_v37 = vmul.f32 %v631_v34, %v631_v34  ;;  %v633_v39 = vpop.f32.mrb[21].mxu0  ;;  %v761_v40 = vpop.f32.mrb[21].mxu1 }
 0x166   :  { %v634_v41 = vpop.f32.mrb[22].mxu0  ;;  %v2212_v42 = vpop.f32.mrb[22].mxu1 }
 0x167   :  { %v1309_v43 = vadd.f32 %v1308_v33, %v1246_v37  ;;  %v1651_v44 = vpack.c.bf16 %v634_v41, %v631_v34  ;;  %v1176_v45 = vadd.f32 %v1175_v36, %v634_v41  ;;  %v1247_v46 = vmul.f32 %v634_v41, %v634_v41  ;;  %v636_v47 = vpop.f32.mrb[23].mxu0  ;;  %v764_v49 = vpop.f32.mrb[23].mxu1 }
 0x168   :  { %v1731_v50 = vpack.c.bf16 %v2212_v42, %v2210_v35 }
 0x169   :  { %1787 = vst [vmem:[#allocation7 + $0x28] sm:$0xff] %v1651_v44   ;;  %v1310_v51 = vadd.f32 %v1309_v43, %v1247_v46 }
 0x16a   :  { %1803 = vst [vmem:[#allocation7 + $0xa8] sm:$0xff] %v1731_v50  }
 0x16c   :  { %v639_v52 = vpop.f32.mrb[24].mxu0  ;;  %v2216_v53 = vpop.f32.mrb[24].mxu1 }
 0x16d   :  { %v1177_v55 = vadd.f32 %v1176_v45, %v639_v52  ;;  %v1248_v56 = vmul.f32 %v639_v52, %v639_v52  ;;  %v641_v57 = vpop.f32.mrb[25].mxu0  ;;  %v769_v58 = vpop.f32.mrb[25].mxu1 }
 0x16e   :  { %v642_v59 = vpop.f32.mrb[26].mxu0  ;;  %v2218_v60 = vpop.f32.mrb[26].mxu1 }
 0x16f   :  { %v1311_v61 = vadd.f32 %v1310_v51, %v1248_v56  ;;  %v1656_v62 = vpack.c.bf16 %v642_v59, %v639_v52  ;;  %v1178_v63 = vadd.f32 %v1177_v55, %v642_v59  ;;  %v1249_v1 = vmul.f32 %v642_v59, %v642_v59  ;;  %v644_v2 = vpop.f32.mrb[27].mxu0  ;;  %v772_v3 = vpop.f32.mrb[27].mxu1 }
 0x170   :  { %v1736_v4 = vpack.c.bf16 %v2218_v60, %v2216_v53 }
 0x171   :  { %1788 = vst [vmem:[#allocation7 + $0x30] sm:$0xff] %v1656_v62   ;;  %v1312_v5 = vadd.f32 %v1311_v61, %v1249_v1 }
 0x172   :  { %1804 = vst [vmem:[#allocation7 + $0xb0] sm:$0xff] %v1736_v4  }
 0x174   :  { %v647_v7 = vpop.f32.mrb[28].mxu0  ;;  %v2222_v8 = vpop.f32.mrb[28].mxu1 }
 0x175   :  { %v1179_v9 = vadd.f32 %v1178_v63, %v647_v7  ;;  %v1250_v10 = vmul.f32 %v647_v7, %v647_v7  ;;  %v649_v11 = vpop.f32.mrb[29].mxu0  ;;  %v777_v12 = vpop.f32.mrb[29].mxu1 }
 0x176   :  { %v650_v13 = vpop.f32.mrb[30].mxu0  ;;  %v2224_v14 = vpop.f32.mrb[30].mxu1 }
 0x177   :  { %v1313_v15 = vadd.f32 %v1312_v5, %v1250_v10  ;;  %v1661_v17 = vpack.c.bf16 %v650_v13, %v647_v7  ;;  %v1180_v19 = vadd.f32 %v1179_v9, %v650_v13  ;;  %v1251_v20 = vmul.f32 %v650_v13, %v650_v13  ;;  %v652_v21 = vpop.f32.mrb[31].mxu0  ;;  %v780_v22 = vpop.f32.mrb[31].mxu1 }
 0x178   :  { %v1741_v25 = vpack.c.bf16 %v2224_v14, %v2222_v8 }
 0x179   :  { %1789 = vst [vmem:[#allocation7 + $0x38] sm:$0xff] %v1661_v17   ;;  %v1314_v26 = vadd.f32 %v1313_v15, %v1251_v20 }
 0x17a   :  { %1805 = vst [vmem:[#allocation7 + $0xb8] sm:$0xff] %v1741_v25  }
 0x17c   :  { %v655_v27 = vpop.f32.mrb[32].mxu0  ;;  %v2228_v28 = vpop.f32.mrb[32].mxu1 }
 0x17d   :  { %v1181_v29 = vadd.f32 %v1180_v19, %v655_v27  ;;  %v1252_v30 = vmul.f32 %v655_v27, %v655_v27  ;;  %v657_v31 = vpop.f32.mrb[33].mxu0  ;;  %v785_v33 = vpop.f32.mrb[33].mxu1 }
 0x17e   :  { %v658_v34 = vpop.f32.mrb[34].mxu0  ;;  %v2230_v36 = vpop.f32.mrb[34].mxu1 }
 0x17f   :  { %v1315_v37 = vadd.f32 %v1314_v26, %v1252_v30  ;;  %v1666_v39 = vpack.c.bf16 %v658_v34, %v655_v27  ;;  %v1182_v40 = vadd.f32 %v1181_v29, %v658_v34  ;;  %v1253_v41 = vmul.f32 %v658_v34, %v658_v34  ;;  %v660_v43 = vpop.f32.mrb[35].mxu0  ;;  %v788_v44 = vpop.f32.mrb[35].mxu1 }
 0x180   :  { %v1746_v45 = vpack.c.bf16 %v2230_v36, %v2228_v28 }
 0x181   :  { %1790 = vst [vmem:[#allocation7 + $0x40] sm:$0xff] %v1666_v39   ;;  %v1316_v46 = vadd.f32 %v1315_v37, %v1253_v41 }
 0x182   :  { %1806 = vst [vmem:[#allocation7 + $0xc0] sm:$0xff] %v1746_v45  }
 0x184   :  { %v663_v47 = vpop.f32.mrb[36].mxu0  ;;  %v2234_v49 = vpop.f32.mrb[36].mxu1 }
 0x185   :  { %v1183_v50 = vadd.f32 %v1182_v40, %v663_v47  ;;  %v1254_v51 = vmul.f32 %v663_v47, %v663_v47  ;;  %v665_v52 = vpop.f32.mrb[37].mxu0  ;;  %v793_v55 = vpop.f32.mrb[37].mxu1 }
 0x186   :  { %v666_v56 = vpop.f32.mrb[38].mxu0  ;;  %v2236_v57 = vpop.f32.mrb[38].mxu1 }
 0x187   :  { %v1317_v58 = vadd.f32 %v1316_v46, %v1254_v51  ;;  %v1671_v59 = vpack.c.bf16 %v666_v56, %v663_v47  ;;  %v1184_v61 = vadd.f32 %v1183_v50, %v666_v56  ;;  %v1255_v62 = vmul.f32 %v666_v56, %v666_v56  ;;  %v668_v63 = vpop.f32.mrb[39].mxu0  ;;  %v796_v1 = vpop.f32.mrb[39].mxu1 }
 0x188   :  { %v1751_v2 = vpack.c.bf16 %v2236_v57, %v2234_v49 }
 0x189   :  { %1791 = vst [vmem:[#allocation7 + $0x48] sm:$0xff] %v1671_v59   ;;  %v1318_v3 = vadd.f32 %v1317_v58, %v1255_v62 }
 0x18a   :  { %1807 = vst [vmem:[#allocation7 + $0xc8] sm:$0xff] %v1751_v2  }
 0x18c   :  { %v671_v4 = vpop.f32.mrb[40].mxu0  ;;  %v2240_v5 = vpop.f32.mrb[40].mxu1 }
 0x18d   :  { %v1185_v7 = vadd.f32 %v1184_v61, %v671_v4  ;;  %v1256_v9 = vmul.f32 %v671_v4, %v671_v4  ;;  %v673_v10 = vpop.f32.mrb[41].mxu0  ;;  %v801_v11 = vpop.f32.mrb[41].mxu1 }
 0x18e   :  { %v674_v12 = vpop.f32.mrb[42].mxu0  ;;  %v2242_v13 = vpop.f32.mrb[42].mxu1 }
 0x18f   :  { %v1319_v15 = vadd.f32 %v1318_v3, %v1256_v9  ;;  %v1676_v17 = vpack.c.bf16 %v674_v12, %v671_v4  ;;  %v1186_v19 = vadd.f32 %v1185_v7, %v674_v12  ;;  %v1257_v20 = vmul.f32 %v674_v12, %v674_v12  ;;  %v676_v21 = vpop.f32.mrb[43].mxu0  ;;  %v804_v22 = vpop.f32.mrb[43].mxu1 }
 0x190   :  { %v1756_v25 = vpack.c.bf16 %v2242_v13, %v2240_v5 }
 0x191   :  { %1792 = vst [vmem:[#allocation7 + $0x50] sm:$0xff] %v1676_v17   ;;  %v1320_v26 = vadd.f32 %v1319_v15, %v1257_v20 }
 0x192   :  { %1808 = vst [vmem:[#allocation7 + $0xd0] sm:$0xff] %v1756_v25  }
 0x194   :  { %v679_v27 = vpop.f32.mrb[44].mxu0  ;;  %v2246_v29 = vpop.f32.mrb[44].mxu1 }
 0x195   :  { %v1187_v30 = vadd.f32 %v1186_v19, %v679_v27  ;;  %v1258_v31 = vmul.f32 %v679_v27, %v679_v27  ;;  %v681_v33 = vpop.f32.mrb[45].mxu0  ;;  %v809_v34 = vpop.f32.mrb[45].mxu1 }
 0x196   :  { %v682_v37 = vpop.f32.mrb[46].mxu0  ;;  %v2248_v39 = vpop.f32.mrb[46].mxu1 }
 0x197   :  { %v1321_v40 = vadd.f32 %v1320_v26, %v1258_v31  ;;  %v1681_v41 = vpack.c.bf16 %v682_v37, %v679_v27  ;;  %v1188_v43 = vadd.f32 %v1187_v30, %v682_v37  ;;  %v1259_v44 = vmul.f32 %v682_v37, %v682_v37  ;;  %v684_v45 = vpop.f32.mrb[47].mxu0  ;;  %v812_v46 = vpop.f32.mrb[47].mxu1 }
 0x198   :  { %v1761_v47 = vpack.c.bf16 %v2248_v39, %v2246_v29 }
 0x199   :  { %1793 = vst [vmem:[#allocation7 + $0x58] sm:$0xff] %v1681_v41   ;;  %v1322_v50 = vadd.f32 %v1321_v40, %v1259_v44 }
 0x19a   :  { %1809 = vst [vmem:[#allocation7 + $0xd8] sm:$0xff] %v1761_v47  }
 0x19c   :  { %v687_v51 = vpop.f32.mrb[48].mxu0  ;;  %v2252_v52 = vpop.f32.mrb[48].mxu1 }
 0x19d   :  { %v1189_v55 = vadd.f32 %v1188_v43, %v687_v51  ;;  %v1260_v56 = vmul.f32 %v687_v51, %v687_v51  ;;  %v689_v58 = vpop.f32.mrb[49].mxu0  ;;  %v817_v59 = vpop.f32.mrb[49].mxu1 }
 0x19e   :  { %v690_v61 = vpop.f32.mrb[50].mxu0  ;;  %v2254_v62 = vpop.f32.mrb[50].mxu1 }
 0x19f   :  { %v1323_v63 = vadd.f32 %v1322_v50, %v1260_v56  ;;  %v1686_v1 = vpack.c.bf16 %v690_v61, %v687_v51  ;;  %v1190_v2 = vadd.f32 %v1189_v55, %v690_v61  ;;  %v1261_v3 = vmul.f32 %v690_v61, %v690_v61  ;;  %v692_v4 = vpop.f32.mrb[51].mxu0  ;;  %v820_v7 = vpop.f32.mrb[51].mxu1 }
 0x1a0   :  { %v1766_v9 = vpack.c.bf16 %v2254_v62, %v2252_v52 }
 0x1a1   :  { %1794 = vst [vmem:[#allocation7 + $0x60] sm:$0xff] %v1686_v1   ;;  %v1324_v10 = vadd.f32 %v1323_v63, %v1261_v3 }
 0x1a2   :  { %1810 = vst [vmem:[#allocation7 + $0xe0] sm:$0xff] %v1766_v9  }
 0x1a4   :  { %v695_v11 = vpop.f32.mrb[52].mxu0  ;;  %v2258_v12 = vpop.f32.mrb[52].mxu1 }
 0x1a5   :  { %v1191_v15 = vadd.f32 %v1190_v2, %v695_v11  ;;  %v1262_v17 = vmul.f32 %v695_v11, %v695_v11  ;;  %v697_v19 = vpop.f32.mrb[53].mxu0  ;;  %v825_v20 = vpop.f32.mrb[53].mxu1 }
 0x1a6   :  { %v698_v21 = vpop.f32.mrb[54].mxu0  ;;  %v2260_v22 = vpop.f32.mrb[54].mxu1 }
 0x1a7   :  { %v1325_v25 = vadd.f32 %v1324_v10, %v1262_v17  ;;  %v1691_v26 = vpack.c.bf16 %v698_v21, %v695_v11  ;;  %v1192_v27 = vadd.f32 %v1191_v15, %v698_v21  ;;  %v1263_v30 = vmul.f32 %v698_v21, %v698_v21  ;;  %v700_v31 = vpop.f32.mrb[55].mxu0  ;;  %v828_v33 = vpop.f32.mrb[55].mxu1 }
 0x1a8   :  { %v1771_v34 = vpack.c.bf16 %v2260_v22, %v2258_v12 }
 0x1a9   :  { %1795 = vst [vmem:[#allocation7 + $0x68] sm:$0xff] %v1691_v26   ;;  %v1326_v37 = vadd.f32 %v1325_v25, %v1263_v30  ;;  %v1268_v30 = vmul.f32 %v2180_v18, %v2180_v18 }
 0x1aa   :  { %1811 = vst [vmem:[#allocation7 + $0xe8] sm:$0xff] %v1771_v34   ;;  %v1269_v34 = vmul.f32 %v2182_v23, %v2182_v23 }
 0x1ac   :  { %v703_v40 = vpop.f32.mrb[56].mxu0  ;;  %v2264_v41 = vpop.f32.mrb[56].mxu1 }
 0x1ad   :  { %v1193_v43 = vadd.f32 %v1192_v27, %v703_v40  ;;  %v1264_v44 = vmul.f32 %v703_v40, %v703_v40  ;;  %v705_v45 = vpop.f32.mrb[57].mxu0  ;;  %v833_v46 = vpop.f32.mrb[57].mxu1 }
 0x1ae   :  { %v706_v47 = vpop.f32.mrb[58].mxu0  ;;  %v2266_v50 = vpop.f32.mrb[58].mxu1 }
 0x1af   :  { %v1327_v51 = vadd.f32 %v1326_v37, %v1264_v44  ;;  %v1696_v55 = vpack.c.bf16 %v706_v47, %v703_v40  ;;  %v1194_v56 = vadd.f32 %v1193_v43, %v706_v47  ;;  %v1265_v58 = vmul.f32 %v706_v47, %v706_v47  ;;  %v708_v59 = vpop.f32.mrb[59].mxu0  ;;  %v836_v61 = vpop.f32.mrb[59].mxu1 }
 0x1b0   :  { %v1776_v63 = vpack.c.bf16 %v2266_v50, %v2264_v41 }
 0x1b1   :  { %1796 = vst [vmem:[#allocation7 + $0x70] sm:$0xff] %v1696_v55   ;;  %v1328_v1 = vadd.f32 %v1327_v51, %v1265_v58 }
 0x1b2   :  { %1812 = vst [vmem:[#allocation7 + $0xf0] sm:$0xff] %v1776_v63  }
 0x1b4   :  { %v711_v2 = vpop.f32.mrb[60].mxu0  ;;  %v2270_v3 = vpop.f32.mrb[60].mxu1 }
 0x1b5   :  { %v1195_v4 = vadd.f32 %v1194_v56, %v711_v2  ;;  %v1266_v7 = vmul.f32 %v711_v2, %v711_v2  ;;  %v713_v9 = vpop.f32.mrb[61].mxu0  ;;  %v841_v10 = vpop.f32.mrb[61].mxu1 }
 0x1b6   :  { %v714_v11 = vpop.f32.mrb[62].mxu0  ;;  %v2272_v15 = vpop.f32.mrb[62].mxu1 }
 0x1b7   :  { %v1329_v17 = vadd.f32 %v1328_v1, %v1266_v7  ;;  %v1701_v19 = vpack.c.bf16 %v714_v11, %v711_v2  ;;  %v1196_v20 = vadd.f32 %v1195_v4, %v714_v11  ;;  %v1267_v21 = vmul.f32 %v714_v11, %v714_v11  ;;  %v716_v25 = vpop.f32.mrb[63].mxu0  ;;  %v844_v26 = vpop.f32.mrb[63].mxu1 }
 0x1b8   :  { %v1781_v27 = vpack.c.bf16 %v2272_v15, %v2270_v3 }
 0x1b9   :  { %1797 = vst [vmem:[#allocation7 + $0x78] sm:$0xff] %v1701_v19   ;;  %v1197_v31 = vadd.f32 %v1196_v20, %v2180_v18  ;;  %v1330_v33 = vadd.f32 %v1329_v17, %v1267_v21 }
 0x1ba   :  { %1813 = vst [vmem:[#allocation7 + $0xf8] sm:$0xff] %v1781_v27  }
 0x1bb   :  { %v1198_v37 = vadd.f32 %v1197_v31, %v2182_v23  ;;  %v1331_v40 = vadd.f32 %v1330_v33, %v1268_v30 }
 0x1bc   :  { %2023 = shalt.err (!%p2020_p6)
}
 0x1bd   :  { %s2024_s20 = scalar_lea.hbm %s2421_s2, 4096 }
 0x1be   :  { %p2025_p7 = scmp.ne.s32.totalorder %s2421_s2, %s2024_s20  ;;  %p2028_p8 = scmp.lt.u32.totalorder %s2024_s20, %s2421_s2 }
 0x1c0   :  { %p2030_p9 = pnand %p2028_p8, %p2025_p7 }
 0x1c2   :  { %2033 = shalt.err (!%p2030_p9)
}
 0x1c3   :  { %1381 = dma.vmem_to_hbm [thread:$0]  %s1376_s16, 4096, %s2421_s2, [#allocation4], %s2090_s0, %s2090_s0, %s2091_s13   ;;  %v1270_v18 = vmul.f32 %v2186_v32, %v2186_v32  ;;  %v1199_v23 = vadd.f32 %v1198_v37, %v2186_v32  ;;  %v1332_v43 = vadd.f32 %v1331_v40, %v1269_v34  ;;  %v1271_v44 = vmul.f32 %v2188_v38, %v2188_v38 }
 0x1c4   :  { %v1272_v47 = vmul.f32 %v2192_v48, %v2192_v48  ;;  %v1273_v56 = vmul.f32 %v2194_v54, %v2194_v54  ;;  %v1274_v32 = vmul.f32 %v2198_v0, %v2198_v0  ;;  %v1284_v37 = vmul.f32 %v2228_v28, %v2228_v28  ;;  %s2094_s2 = smov [#allocation8]   ;;  %s2095_s28 = smov [#allocation10]  }
 0x1c5   :  { %v1200_v45 = vadd.f32 %v1199_v23, %v2188_v38  ;;  %v1333_v46 = vadd.f32 %v1332_v43, %v1270_v18  ;;  %v1275_v38 = vmul.f32 %v2200_v6, %v2200_v6  ;;  %v1285_v23 = vmul.f32 %v2230_v36, %v2230_v36  ;;  %s1388_s27 = sshll.u32 %s2094_s2, 4  ;;  %s1398_s29 = sshll.u32 %s2095_s28, 4  ;;  %s1389_s27 = int_to_ptr.vmem [resolvable:$true] %s1388_s27  ;;  %s2387_s29 = int_to_ptr.vmem [resolvable:$true] %s1398_s29 }
 0x1c6   :  { %s2034_s30 = scalar_lea.vmem %s1389_s27, 16  ;;  %s2038_s5 = scalar_lea.vmem %s1389_s27, 32 }
 0x1c7   :  { %v1201_v51 = vadd.f32 %v1200_v45, %v2192_v48  ;;  %v1334_v55 = vadd.f32 %v1333_v46, %v1271_v44  ;;  %v1276_v48 = vmul.f32 %v2204_v16, %v2204_v16  ;;  %v1286_v44 = vmul.f32 %v2234_v49, %v2234_v49  ;;  %p2035_p10 = scmp.ne.s32.totalorder %s1389_s27, %s2034_s30  ;;  %p2039_p11 = scmp.lt.s32.totalorder %s1389_s27, %s1389_s27 }
 0x1c8   :  { %v1287_v46 = vmul.f32 %v2236_v57, %v2236_v57  ;;  %p2040_p12 = scmp.lt.s32.totalorder %s2038_s5, %s2034_s30 }
 0x1c9   :  { %v1202_v58 = vadd.f32 %v1201_v51, %v2194_v54  ;;  %v1335_v59 = vadd.f32 %v1334_v55, %v1272_v47  ;;  %v1277_v54 = vmul.f32 %v2206_v24, %v2206_v24  ;;  %v1288_v51 = vmul.f32 %v2240_v5, %v2240_v5 }
 0x1ca   :  { %p2041_p13 = por %p2040_p12, %p2039_p11 }
 0x1cb   :  { %v1203_v61 = vadd.f32 %v1202_v58, %v2198_v0  ;;  %v1336_v63 = vadd.f32 %v1335_v59, %v1273_v56  ;;  %v1278_v0 = vmul.f32 %v2210_v35, %v2210_v35  ;;  %v1289_v56 = vmul.f32 %v2242_v13, %v2242_v13 }
 0x1cc   :  { %v1290_v59 = vmul.f32 %v2246_v29, %v2246_v29  ;;  %p2042_p0 = pnand %p2041_p13, %p2035_p10 }
 0x1cd   :  { %v1204_v1 = vadd.f32 %v1203_v61, %v2200_v6  ;;  %v1337_v2 = vadd.f32 %v1336_v63, %v1274_v32  ;;  %v1279_v6 = vmul.f32 %v2212_v42, %v2212_v42  ;;  %v1291_v61 = vmul.f32 %v2248_v39, %v2248_v39 }
 0x1cf   :  { %v1338_v4 = vadd.f32 %v1337_v2, %v1275_v38  ;;  %v1205_v7 = vadd.f32 %v1204_v1, %v2204_v16  ;;  %v1280_v16 = vmul.f32 %v2216_v53, %v2216_v53  ;;  %v1292_v38 = vmul.f32 %v2252_v52, %v2252_v52 }
 0x1d0   :  { %v1293_v2 = vmul.f32 %v2254_v62, %v2254_v62 }
 0x1d1   :  { %v1206_v9 = vadd.f32 %v1205_v7, %v2206_v24  ;;  %v1339_v10 = vadd.f32 %v1338_v4, %v1276_v48  ;;  %v1281_v24 = vmul.f32 %v2218_v60, %v2218_v60  ;;  %v1294_v4 = vmul.f32 %v2258_v12, %v2258_v12 }
 0x1d3   :  { %v1207_v11 = vadd.f32 %v1206_v9, %v2210_v35  ;;  %v1340_v17 = vadd.f32 %v1339_v10, %v1277_v54  ;;  %v1282_v35 = vmul.f32 %v2222_v8, %v2222_v8  ;;  %v1295_v54 = vmul.f32 %v2260_v22, %v2260_v22 }
 0x1d4   :  { %v1296_v10 = vmul.f32 %v2264_v41, %v2264_v41 }
 0x1d5   :  { %v1208_v19 = vadd.f32 %v1207_v11, %v2212_v42  ;;  %v1341_v20 = vadd.f32 %v1340_v17, %v1278_v0  ;;  %v1283_v42 = vmul.f32 %v2224_v14, %v2224_v14  ;;  %v1297_v11 = vmul.f32 %v2266_v50, %v2266_v50 }
 0x1d7   :  { %v1209_v21 = vadd.f32 %v1208_v19, %v2216_v53  ;;  %v1342_v25 = vadd.f32 %v1341_v20, %v1279_v6  ;;  %v1299_v20 = vmul.f32 %v2272_v15, %v2272_v15 }
 0x1d9   :  { %v1210_v26 = vadd.f32 %v1209_v21, %v2218_v60  ;;  %v1343_v27 = vadd.f32 %v1342_v25, %v1280_v16 }
 0x1db   :  { %v1211_v30 = vadd.f32 %v1210_v26, %v2222_v8  ;;  %v1344_v31 = vadd.f32 %v1343_v27, %v1281_v24 }
 0x1dd   :  { %v1212_v33 = vadd.f32 %v1211_v30, %v2224_v14  ;;  %v1345_v34 = vadd.f32 %v1344_v31, %v1282_v35 }
 0x1df   :  { %v1213_v53 = vadd.f32 %v1212_v33, %v2228_v28  ;;  %v1346_v40 = vadd.f32 %v1345_v34, %v1283_v42 }
 0x1e1   :  { %v1347_v60 = vadd.f32 %v1346_v40, %v1284_v37  ;;  %v1214_v18 = vadd.f32 %v1213_v53, %v2230_v36 }
 0x1e3   :  { %v1348_v8 = vadd.f32 %v1347_v60, %v1285_v23  ;;  %v1215_v43 = vadd.f32 %v1214_v18, %v2234_v49 }
 0x1e5   :  { %v1349_v14 = vadd.f32 %v1348_v8, %v1286_v44  ;;  %v1216_v45 = vadd.f32 %v1215_v43, %v2236_v57 }
 0x1e7   :  { %v1350_v28 = vadd.f32 %v1349_v14, %v1287_v46  ;;  %v1217_v47 = vadd.f32 %v1216_v45, %v2240_v5 }
 0x1e9   :  { %v1351_v55 = vadd.f32 %v1350_v28, %v1288_v51  ;;  %v1218_v36 = vadd.f32 %v1217_v47, %v2242_v13 }
 0x1eb   :  { %v1352_v58 = vadd.f32 %v1351_v55, %v1289_v56  ;;  %v1219_v49 = vadd.f32 %v1218_v36, %v2246_v29 }
 0x1ed   :  { %v1353_v32 = vadd.f32 %v1352_v58, %v1290_v59  ;;  %v1220_v57 = vadd.f32 %v1219_v49, %v2248_v39 }
 0x1ef   :  { %v1354_v63 = vadd.f32 %v1353_v32, %v1291_v61  ;;  %v1221_v5 = vadd.f32 %v1220_v57, %v2252_v52 }
 0x1f1   :  { %v1355_v1 = vadd.f32 %v1354_v63, %v1292_v38  ;;  %v1222_v13 = vadd.f32 %v1221_v5, %v2254_v62 }
 0x1f3   :  { %v1356_v48 = vadd.f32 %v1355_v1, %v1293_v2  ;;  %v1223_v29 = vadd.f32 %v1222_v13, %v2258_v12  ;;  %v1298_v12 = vmul.f32 %v2270_v3, %v2270_v3 }
 0x1f5   :  { %v1357_v7 = vadd.f32 %v1356_v48, %v1294_v4  ;;  %v1224_v39 = vadd.f32 %v1223_v29, %v2260_v22 }
 0x1f7   :  { %v1358_v9 = vadd.f32 %v1357_v7, %v1295_v54  ;;  %v1225_v52 = vadd.f32 %v1224_v39, %v2264_v41 }
 0x1f9   :  { %v1359_v0 = vadd.f32 %v1358_v9, %v1296_v10  ;;  %v1226_v62 = vadd.f32 %v1225_v52, %v2266_v50 }
 0x1fb   :  { %v1360_v17 = vadd.f32 %v1359_v0, %v1297_v11  ;;  %v1227_v6 = vadd.f32 %v1226_v62, %v2270_v3 }
 0x1fd   :  { %v1361_v19 = vadd.f32 %v1360_v17, %v1298_v12  ;;  %v1228_v22 = vadd.f32 %v1227_v6, %v2272_v15 }
 0x1ff   :  { %v1229_v16 = vrot.slane %v1228_v22, 4  ;;  %v1362_v41 = vadd.f32 %v1361_v19, %v1299_v20 }
 0x201   :  { %v1230_v21 = vadd.f32 %v1229_v16, %v1228_v22  ;;  %v1363_v25 = vrot.slane %v1362_v41, 4 }
 0x203   :  { %v1231_v24 = vrot.slane %v1230_v21, 2  ;;  %v1364_v26 = vadd.f32 %v1363_v25, %v1362_v41 }
 0x205   :  { %v1232_v27 = vadd.f32 %v1231_v24, %v1230_v21  ;;  %v1365_v50 = vrot.slane %v1364_v26, 2 }
 0x207   :  { %v1233_v35 = vrot.slane %v1232_v27, 1  ;;  %v1366_v30 = vadd.f32 %v1365_v50, %v1364_v26 }
 0x209   :  { %v1234_v3 = vadd.f32 %v1233_v35, %v1232_v27  ;;  %v1367_v31 = vrot.slane %v1366_v30, 1 }
 0x20b   :  { %1235 = vst [vmem:[#allocation8] sm:$0x1] %v1234_v3  ;;  %v1368_v42 = vadd.f32 %v1367_v31, %v1366_v30 }
 0x20c   :  { %2045 = shalt.err (!%p2042_p0)
}
 0x20d   :  { %s2046_s8 = scalar_lea.hbm %s2422_s3, 16 }
 0x20e   :  { %p2047_p1 = scmp.ne.s32.totalorder %s2422_s3, %s2046_s8  ;;  %p2050_p2 = scmp.lt.u32.totalorder %s2046_s8, %s2422_s3 }
 0x210   :  { %p2052_p3 = pnand %p2050_p2, %p2047_p1 }
 0x212   :  { %2055 = shalt.err (!%p2052_p3)
}
 0x213   :  { %1391 = dma.vmem_to_hbm [thread:$0]  %s1389_s27, 16, %s2422_s3, [#allocation9]   ;;  %1369 = vst [vmem:[#allocation10] sm:$0x1] %v1368_v42 }
 0x214   :  { %s2056_s14 = scalar_lea.vmem %s2387_s29, 16  ;;  %s2060_s15 = scalar_lea.vmem %s2387_s29, 32 }
 0x215   :  { %p2057_p4 = scmp.ne.s32.totalorder %s2387_s29, %s2056_s14  ;;  %p2061_p5 = scmp.lt.s32.totalorder %s2387_s29, %s2387_s29 }
 0x216   :  { %p2062_p6 = scmp.lt.s32.totalorder %s2060_s15, %s2056_s14 }
 0x218   :  { %p2063_p7 = por %p2062_p6, %p2061_p5 }
 0x21a   :  { %p2064_p8 = pnand %p2063_p7, %p2057_p4 }
 0x21c   :  { %2067 = shalt.err (!%p2064_p8)
}
 0x21d   :  { %s2068_s17 = scalar_lea.hbm %s2423_s4, 16 }
 0x21e   :  { %p2069_p9 = scmp.ne.s32.totalorder %s2423_s4, %s2068_s17  ;;  %p2072_p10 = scmp.lt.u32.totalorder %s2068_s17, %s2423_s4 }
 0x220   :  { %p2074_p11 = pnand %p2072_p10, %p2069_p9 }
 0x222   :  { %2077 = shalt.err (!%p2074_p11)
}
 0x223   :  { %1401 = dma.vmem_to_hbm [thread:$0]  %s2387_s29, 16, %s2423_s4, [#allocation9]  }
 0x224   :  { %2082 = dma.done.wait [#allocation4], 4096  }
 0x225   :  { %2083 = vsyncadd [#allocation4], 4294963200 }
 0x226   :  { %2084 = dma.done.wait [#allocation9], 32  }
 0x227   :  { %2085 = vsyncadd [#allocation9], 4294967264 }
 0x228   :  { %1411 = vsyncpa [#allocation3], 1 }
 0x229   :  { %1412 = vsyncpa [#allocation6], 1 }
 0x22a   :  { %1413 = vsyncpa [#allocation4], 1 }
 0x22b   :  { %1414 = vsyncpa [#allocation9], 1 }

</bundles_post_ra>
